<compile_context>
chip_gen: v7x
topology: tpu7x:2x2x1
jax: 0.10.0
libtpu: 0.0.40
codegen_flags: <defaults>
</compile_context>

<pallas_src>
import math

import jax
import jax.numpy as jnp
from jax.experimental import pallas as pl
from jax.experimental.pallas import tpu as pltpu

# Below this many input channels, skip the MXU and do the channel mix as
# broadcast FMAs on the VPU (MXU push/pop latency dominates tiny-K matmuls).
_VPU_CHANNEL_MIX_MAX_CIN = 8


def conv1x1_relu_kernel(x_ref, w_ref, b_ref, o_ref):
    # x_ref: (C_in, T)  w_ref: (C_out, C_in)  b_ref: (C_out, 1)  o_ref: (C_out, T)
    x = x_ref[...]
    w = w_ref[...]
    b = b_ref[...]
    c_out, c_in = w.shape
    t = x.shape[1]

    if c_in <= _VPU_CHANNEL_MIX_MAX_CIN:
        # Tiny contraction dim: C_in outer-product FMAs on the VALU slots.
        y = jnp.broadcast_to(b, (c_out, t)).astype(jnp.float32)
        for ic in range(c_in):                         # static unroll
            y = y + w[:, ic:ic + 1] * x[ic:ic + 1, :]
    else:
        # Larger channel mix: one MXU matmul over the full token tile, f32 acc.
        # (For big C on v6e/v7x, casting W/X to bf16 here engages the fast MXU
        # path; kept f32 for exactness at these sizes.)
        y = jnp.dot(w, x, preferred_element_type=jnp.float32) + b

    o_ref[...] = jnp.maximum(y, 0.0).astype(o_ref.dtype)


def convolnet_forward(src, weight, bias, *, token_tile=512):
    """ConvolNet.forward: returns (src, relu(conv1d(src))).

    src: (N, C_in, L) f32; weight: (C_out, C_in, 1); bias: (C_out,).
    """
    n, c_in, length = src.shape
    c_out = weight.shape[0]
    nl = n * length

    # Layout plumbing in the wrapper: fuse batch & length into one token axis.
    x2d = jnp.transpose(src, (1, 0, 2)).reshape(c_in, nl)   # (C_in, N*L)
    w2d = weight[:, :, 0]                                   # (C_out, C_in)
    b2d = bias.reshape(c_out, 1)                            # (C_out, 1)

    # Tile the fused token axis only when it is big enough to be worth a grid
    # (~0.35 us pipeline overhead per grid step).  512-lane tiles hit ~85% of
    # HBM roofline; >=2 parallel steps also feeds both v7x TensorCores.
    if nl >= 2 * token_tile and nl % token_tile == 0:
        tile = token_tile
    else:
        tile = nl
    grid = (nl // tile,)

    cost = pl.CostEstimate(
        flops=2 * c_out * c_in * nl + 2 * c_out * nl,        # matmul + bias/relu
        transcendentals=0,
        bytes_accessed=4 * (c_in * nl + c_out * nl + c_out * c_in + c_out),
    )

    out2d = pl.pallas_call(
        conv1x1_relu_kernel,
        out_shape=jax.ShapeDtypeStruct((c_out, nl), src.dtype),
        grid=grid,
        in_specs=[
            pl.BlockSpec((c_in, tile), lambda i: (0, i)),    # token-tiled input
            pl.BlockSpec((c_out, c_in), lambda i: (0, 0)),   # weights resident
            pl.BlockSpec((c_out, 1), lambda i: (0, 0)),      # bias resident
        ],
        out_specs=pl.BlockSpec((c_out, tile), lambda i: (0, i)),
        compiler_params=pltpu.CompilerParams(
            dimension_semantics=("parallel",),
        ),
        cost_estimate=cost,
    )(x2d, w2d, b2d)

    # Back to PyTorch's NCL layout.
    out = jnp.transpose(out2d.reshape(c_out, n, length), (1, 0, 2))
    return src, out


def init_params(key, in_dim, h_dim, kernel=1):
    """Deterministic init mirroring nn.Conv1d default (uniform +/- 1/sqrt(fan_in))."""
    kw, kb = jax.random.split(key)
    fan_in = in_dim * kernel
    bound = 1.0 / math.sqrt(fan_in)
    weight = jax.random.uniform(
        kw, (h_dim, in_dim, kernel), minval=-bound, maxval=bound, dtype=jnp.float32
    )
    bias = jax.random.uniform(
        kb, (h_dim,), minval=-bound, maxval=bound, dtype=jnp.float32
    )
    return weight, bias


if __name__ == "__main__":
    key = jax.random.PRNGKey(0)
    k_x, k_p = jax.random.split(key)

    batch, in_dim, h_dim, length = 2, 4, 32, 16
    src = jax.random.normal(k_x, (batch, in_dim, length), dtype=jnp.float32)
    weight, bias = init_params(k_p, in_dim, h_dim, kernel=1)

    src_out, hid = convolnet_forward(src, weight, bias)
    jax.block_until_ready((src_out, hid))

    # Reference check in plain JAX (conv1d with kernel=1 == einsum + bias + relu)
    ref = jnp.maximum(
        jnp.einsum("oc,ncl->nol", weight[:, :, 0], src) + bias[None, :, None], 0.0
    )
    assert hid.shape == (batch, h_dim, length)
    assert jnp.allclose(hid, ref, atol=1e-5, rtol=1e-5)
    assert jnp.array_equal(src_out, src)

    print("KERNEL_OK")
</pallas_src>

<mosaic_0001>
module attributes {stable_mosaic.version = 11 : i64} {
  func.func @conv1x1_relu_kernel(%arg0: i32, %arg1: memref<4x32xf32, #tpu.memory_space<vmem>>, %arg2: memref<32x4xf32, #tpu.memory_space<vmem>>, %arg3: memref<32x1xf32, #tpu.memory_space<vmem>>, %arg4: memref<32x32xf32, #tpu.memory_space<vmem>>) attributes {dimension_semantics = [#tpu.dimension_semantics<parallel>], iteration_bounds = array<i64: 1>, scalar_prefetch = 0 : i64, scratch_operands = 0 : i64, tpu.core_type = #tpu.core_type<tc>, window_params = [{transform_indices = @transform_0, window_bounds = array<i64: 4, 32>}, {pipeline_mode = #tpu.pipeline_mode<synchronous>, transform_indices = @transform_1, window_bounds = array<i64: 32, 4>}, {pipeline_mode = #tpu.pipeline_mode<synchronous>, transform_indices = @transform_2, window_bounds = array<i64: 32, 1>}, {transform_indices = @transform_3, window_bounds = array<i64: 32, 32>}]} {
    %c0 = arith.constant 0 : index
    %c0_0 = arith.constant 0 : index
    %0 = vector.load %arg1[%c0, %c0_0] : memref<4x32xf32, #tpu.memory_space<vmem>>, vector<4x32xf32>
    %c0_1 = arith.constant 0 : index
    %c0_2 = arith.constant 0 : index
    %1 = vector.load %arg2[%c0_1, %c0_2] : memref<32x4xf32, #tpu.memory_space<vmem>>, vector<32x4xf32>
    %c0_3 = arith.constant 0 : index
    %c0_4 = arith.constant 0 : index
    %2 = vector.load %arg3[%c0_3, %c0_4] : memref<32x1xf32, #tpu.memory_space<vmem>>, vector<32x1xf32>
    %3 = vector.shape_cast %2 : vector<32x1xf32> to vector<32x1xf32>
    %4 = vector.broadcast %3 : vector<32x1xf32> to vector<32x32xf32>
    %5 = vector.extract_strided_slice %1 {offsets = [0, 0], sizes = [32, 1], strides = [1, 1]} : vector<32x4xf32> to vector<32x1xf32>
    %6 = vector.extract_strided_slice %0 {offsets = [0, 0], sizes = [1, 32], strides = [1, 1]} : vector<4x32xf32> to vector<1x32xf32>
    %7 = vector.broadcast %5 : vector<32x1xf32> to vector<32x32xf32>
    %8 = vector.broadcast %6 : vector<1x32xf32> to vector<32x32xf32>
    %9 = arith.mulf %7, %8 : vector<32x32xf32>
    %10 = arith.addf %4, %9 : vector<32x32xf32>
    %11 = vector.extract_strided_slice %1 {offsets = [0, 1], sizes = [32, 1], strides = [1, 1]} : vector<32x4xf32> to vector<32x1xf32>
    %12 = vector.extract_strided_slice %0 {offsets = [1, 0], sizes = [1, 32], strides = [1, 1]} : vector<4x32xf32> to vector<1x32xf32>
    %13 = vector.broadcast %11 : vector<32x1xf32> to vector<32x32xf32>
    %14 = vector.broadcast %12 : vector<1x32xf32> to vector<32x32xf32>
    %15 = arith.mulf %13, %14 : vector<32x32xf32>
    %16 = arith.addf %10, %15 : vector<32x32xf32>
    %17 = vector.extract_strided_slice %1 {offsets = [0, 2], sizes = [32, 1], strides = [1, 1]} : vector<32x4xf32> to vector<32x1xf32>
    %18 = vector.extract_strided_slice %0 {offsets = [2, 0], sizes = [1, 32], strides = [1, 1]} : vector<4x32xf32> to vector<1x32xf32>
    %19 = vector.broadcast %17 : vector<32x1xf32> to vector<32x32xf32>
    %20 = vector.broadcast %18 : vector<1x32xf32> to vector<32x32xf32>
    %21 = arith.mulf %19, %20 : vector<32x32xf32>
    %22 = arith.addf %16, %21 : vector<32x32xf32>
    %23 = vector.extract_strided_slice %1 {offsets = [0, 3], sizes = [32, 1], strides = [1, 1]} : vector<32x4xf32> to vector<32x1xf32>
    %24 = vector.extract_strided_slice %0 {offsets = [3, 0], sizes = [1, 32], strides = [1, 1]} : vector<4x32xf32> to vector<1x32xf32>
    %25 = vector.broadcast %23 : vector<32x1xf32> to vector<32x32xf32>
    %26 = vector.broadcast %24 : vector<1x32xf32> to vector<32x32xf32>
    %27 = arith.mulf %25, %26 : vector<32x32xf32>
    %28 = arith.addf %22, %27 : vector<32x32xf32>
    %cst = arith.constant 0.000000e+00 : f32
    %29 = vector.broadcast %cst : f32 to vector<32x32xf32>
    %30 = arith.maximumf %28, %29 : vector<32x32xf32>
    %c0_5 = arith.constant 0 : index
    %c0_6 = arith.constant 0 : index
    %31 = vector.load %arg4[%c0_5, %c0_6] : memref<32x32xf32, #tpu.memory_space<vmem>>, vector<32x32xf32>
    tpu.vector_store %arg4[%c0_5, %c0_6], %30 {strides = array<i32>} : memref<32x32xf32, #tpu.memory_space<vmem>>, vector<32x32xf32>,
    return
  }
  func.func @transform_0(%arg0: i32) -> (i32, i32) {
    %c0_i32 = arith.constant 0 : i32
    %c0_i32_0 = arith.constant 0 : i32
    return %c0_i32, %arg0 : i32, i32
  }
  func.func @transform_1(%arg0: i32) -> (i32, i32) {
    %c0_i32 = arith.constant 0 : i32
    %c0_i32_0 = arith.constant 0 : i32
    %c0_i32_1 = arith.constant 0 : i32
    return %c0_i32, %c0_i32_0 : i32, i32
  }
  func.func @transform_2(%arg0: i32) -> (i32, i32) {
    %c0_i32 = arith.constant 0 : i32
    %c0_i32_0 = arith.constant 0 : i32
    %c0_i32_1 = arith.constant 0 : i32
    return %c0_i32, %c0_i32_0 : i32, i32
  }
  func.func @transform_3(%arg0: i32) -> (i32, i32) {
    %c0_i32 = arith.constant 0 : i32
    %c0_i32_0 = arith.constant 0 : i32
    return %c0_i32, %arg0 : i32, i32
  }
}

</mosaic_0001>

<bundles_post_ra>
// kernel: tpu_custom_call.1
= control target key start
LH: loop header
LB: loop body
LE: loop exit
PB: predicated region body
PF: predicated region fallthrough
CT: control target
= control target key end

     0   :  { %v224_v2 = vmov 0   ;;  %s294_s0 = inlined_call_operand.vmem [shape: f32[4,32], index: 0, kind: input, shape index: {}]   ;;  %s295_s1 = inlined_call_operand.vmem [shape: f32[32,4], index: 1, kind: input, shape index: {}]   ;;  %s296_s2 = inlined_call_operand.vmem [shape: f32[32,1], index: 2, kind: input, shape index: {}]   ;;  %s297_s3 = inlined_call_operand.hbm [shape: f32[32,32], index: 3, kind: output, shape index: {}]  }
   0x1   :  { %v18_v0 = vld [vmem:[%s295_s1 + $0x10] sm:$0xff]  ;;  %v16_v1 = vld [vmem:[%s295_s1] sm:$0xff]  ;;  %193 = vset.pattern.permute.xlu1 %v224_v2  ;;  %192 = vset.pattern.permute.xlu0 %v224_v2  ;;  %v19_v3 = vld [vmem:[%s295_s1 + $0x18] sm:$0xff] }
   0x2   :  { %56 = vperm.xlu1 %193, %v18_v0   ;;  %46 = vperm.xlu0 %192, %v16_v1   ;;  %v17_v4 = vld [vmem:[%s295_s1 + $0x8] sm:$0xff] }
   0x3   :  { %8 = vsyncpa [#allocation3], 0  ;;  %v21_v5 = vld [vmem:[%s296_s2 + $0x8] sm:$0xff]  ;;  %v20_v6 = vld [vmem:[%s296_s2] sm:$0xff]  ;;  %v225_v9 = vmov 1   ;;  %v226_v10 = vmov 2   ;;  %v64_v18 = vlaneseq }
   0x4   :  { %v23_v7 = vld [vmem:[%s296_s2 + $0x18] sm:$0xff]  ;;  %v22_v8 = vld [vmem:[%s296_s2 + $0x10] sm:$0xff]  ;;  %v227_v11 = vmov 3   ;;  %v15_v26 = vld [vmem:[%s294_s0] sm:$0xf]  ;;  %vm164_vm0 = vcmask 261120  }
   0x5   :  { %v65_v21 = vshrl.u32 %v64_v18, 7  ;;  %s228_s0 = smov [#allocation2]  }
   0x6   :  { %61 = vperm.xlu1 %193, %v19_v3   ;;  %51 = vperm.xlu0 %192, %v17_v4   ;;  %s174_s28 = sshll.u32 %s228_s0, 4  ;;  %s175_s28 = int_to_ptr.vmem [resolvable:$true] %s174_s28 }
   0x7   :  { %v66_v24 = vsub.s32 0, %v65_v21  ;;  %v94_v25 = vsub.s32 1, %v65_v21  ;;  %v122_v27 = vsub.s32 2, %v65_v21  ;;  %v150_v34 = vsub.s32 3, %v65_v21  ;;  %s200_s29 = scalar_lea.vmem %s175_s28, 512  ;;  %p205_p1 = scmp.lt.s32.totalorder %s175_s28, %s175_s28 }
   0x8   :  { %p201_p0 = scmp.ne.s32.totalorder %s175_s28, %s200_s29  ;;  %p206_p2 = scmp.lt.s32.totalorder %s200_s29, %s200_s29 }
   0x9   :  { %v67_v30 = vrot.slane %v15_v26, %v66_v24  ;;  %v95_v31 = vrot.slane %v15_v26, %v94_v25  ;;  %v123_v33 = vrot.slane %v15_v26, %v122_v27  ;;  %v151_v40 = vrot.slane %v15_v26, %v150_v34 }
   0xa   :  { %31 = vperm.xlu1 %193, %v21_v5   ;;  %26 = vperm.xlu0 %192, %v20_v6   ;;  %p207_p3 = por %p206_p2, %p205_p1 }
   0xc   :  { %p208_p4 = pnand %p207_p3, %p201_p0 }
   0xe   :  { %41 = vperm.xlu1 %193, %v23_v7   ;;  %36 = vperm.xlu0 %192, %v22_v8  }
  0x12   :  { %195 = vset.pattern.permute.xlu1 %v225_v9  ;;  %194 = vset.pattern.permute.xlu0 %v225_v9 }
  0x13   :  { %81 = vperm.xlu1 %195, %v17_v4   ;;  %77 = vperm.xlu0 %194, %v16_v1  }
  0x17   :  { %85 = vperm.xlu1 %195, %v18_v0   ;;  %89 = vperm.xlu0 %194, %v19_v3  }
  0x1b   :  { %196 = vset.pattern.permute.xlu1 %v226_v10  ;;  %197 = vset.pattern.permute.xlu0 %v226_v10 }
  0x1c   :  { %105 = vperm.xlu1 %196, %v16_v1   ;;  %109 = vperm.xlu0 %197, %v17_v4  }
  0x20   :  { %113 = vperm.xlu1 %196, %v18_v0   ;;  %198 = vset.pattern.permute.xlu0 %v227_v11 }
  0x21   :  { %133 = vperm.xlu0 %198, %v16_v1  }
  0x24   :  { %117 = vperm.xlu1 %196, %v19_v3  }
  0x25   :  { %145 = vperm.xlu0 %198, %v19_v3  }
  0x28   :  { %199 = vset.pattern.permute.xlu1 %v227_v11 }
  0x29   :  { %137 = vperm.xlu1 %199, %v17_v4  }
  0x2d   :  { %141 = vperm.xlu1 %199, %v18_v0  }
  0x81   :  { %v57_v12 = vpop.permute.xlu1 %56  ;;  %v47_v13 = vpop.permute.xlu0 %46 }
  0x82   :  { %v68_v32 = vmul.f32 %v67_v30, %v47_v13  ;;  %v70_v61 = vmul.f32 %v67_v30, %v57_v12 }
  0x85   :  { %v62_v14 = vpop.permute.xlu1 %61  ;;  %v52_v15 = vpop.permute.xlu0 %51 }
  0x86   :  { %v71_v43 = vmul.f32 %v67_v30, %v62_v14  ;;  %v69_v46 = vmul.f32 %v67_v30, %v52_v15 }
  0x89   :  { %v32_v16 = vpop.permute.xlu1 %31  ;;  %v27_v17 = vpop.permute.xlu0 %26 }
  0x8a   :  { %v72_v38 = vadd.f32 %v68_v32, %v27_v17  ;;  %v73_v56 = vadd.f32 %v69_v46, %v32_v16 }
  0x8d   :  { %v42_v19 = vpop.permute.xlu1 %41  ;;  %v37_v20 = vpop.permute.xlu0 %36 }
  0x8e   :  { %v75_v49 = vadd.f32 %v71_v43, %v42_v19  ;;  %v74_v2 = vadd.f32 %v70_v61, %v37_v20 }
  0x92   :  { %v82_v22 = vpop.permute.xlu1 %81  ;;  %v78_v23 = vpop.permute.xlu0 %77 }
  0x93   :  { %v96_v35 = vmul.f32 %v95_v31, %v78_v23  ;;  %v97_v50 = vmul.f32 %v95_v31, %v82_v22 }
  0x95   :  { %v100_v41 = vadd.f32 %v96_v35, %v72_v38  ;;  %v101_v62 = vadd.f32 %v97_v50, %v73_v56 }
  0x96   :  { %v86_v28 = vpop.permute.xlu1 %85  ;;  %v90_v29 = vpop.permute.xlu0 %89 }
  0x97   :  { %v99_v44 = vmul.f32 %v95_v31, %v90_v29  ;;  %v98_v63 = vmul.f32 %v95_v31, %v86_v28 }
  0x99   :  { %v103_v53 = vadd.f32 %v99_v44, %v75_v49  ;;  %v102_v7 = vadd.f32 %v98_v63, %v74_v2 }
  0x9b   :  { %v106_v36 = vpop.permute.xlu1 %105  ;;  %v110_v37 = vpop.permute.xlu0 %109 }
  0x9c   :  { %v124_v39 = vmul.f32 %v123_v33, %v106_v36  ;;  %v125_v57 = vmul.f32 %v123_v33, %v110_v37 }
  0x9e   :  { %v128_v47 = vadd.f32 %v124_v39, %v100_v41  ;;  %v129_v3 = vadd.f32 %v125_v57, %v101_v62 }
  0x9f   :  { %v114_v42 = vpop.permute.xlu1 %113 }
  0xa0   :  { %v134_v45 = vpop.permute.xlu0 %133  ;;  %v126_v4 = vmul.f32 %v123_v33, %v114_v42 }
  0xa1   :  { %v152_v48 = vmul.f32 %v151_v40, %v134_v45 }
  0xa2   :  { %v130_v10 = vadd.f32 %v126_v4, %v102_v7 }
  0xa3   :  { %v156_v51 = vadd.f32 %v152_v48, %v128_v47  ;;  %v118_v52 = vpop.permute.xlu1 %117 }
  0xa4   :  { %v127_v54 = vmul.f32 %v123_v33, %v118_v52  ;;  %v146_v55 = vpop.permute.xlu0 %145 }
  0xa5   :  { %v160_v58 = vmax.f32 %v156_v51, 0.0  ;;  %v155_v59 = vmul.f32 %v151_v40, %v146_v55 }
  0xa6   :  { %v131_v60 = vadd.f32 %v127_v54, %v103_v53 }
  0xa7   :  { %165 = vst.msk [vmem:[#allocation2] sm:$0xff] %vm164_vm0, %v160_v58 }
  0xa8   :  { %v159_v0 = vadd.f32 %v155_v59, %v131_v60  ;;  %v138_v1 = vpop.permute.xlu1 %137 }
  0xa9   :  { %v153_v5 = vmul.f32 %v151_v40, %v138_v1 }
  0xaa   :  { %v163_v6 = vmax.f32 %v159_v0, 0.0 }
  0xab   :  { %v157_v8 = vadd.f32 %v153_v5, %v129_v3 }
  0xac   :  { %168 = vst.msk [vmem:[#allocation2 + $0x18] sm:$0xff] %vm164_vm0, %v163_v6  ;;  %v142_v9 = vpop.permute.xlu1 %141 }
  0xad   :  { %v161_v11 = vmax.f32 %v157_v8, 0.0  ;;  %v154_v13 = vmul.f32 %v151_v40, %v142_v9 }
  0xaf   :  { %166 = vst.msk [vmem:[#allocation2 + $0x8] sm:$0xff] %vm164_vm0, %v161_v11  ;;  %v158_v12 = vadd.f32 %v154_v13, %v130_v10 }
  0xb1   :  { %v162_v14 = vmax.f32 %v158_v12, 0.0 }
  0xb3   :  { %167 = vst.msk [vmem:[#allocation2 + $0x10] sm:$0xff] %vm164_vm0, %v162_v14 }
  0xb4   :  { %211 = shalt.err (!%p208_p4)
}
  0xb5   :  { %s212_s5 = scalar_lea.hbm %s297_s3, 512 }
  0xb6   :  { %p213_p5 = scmp.ne.s32.totalorder %s297_s3, %s212_s5  ;;  %p216_p6 = scmp.lt.u32.totalorder %s212_s5, %s297_s3 }
  0xb8   :  { %p218_p7 = pnand %p216_p6, %p213_p5 }
  0xba   :  { %221 = shalt.err (!%p218_p7)
}
  0xbb   :  { %s229_s10 = smov 128   ;;  %s230_s11 = smov 8  }
  0xbc   :  { %180 = dma.vmem_to_hbm [thread:$0]  %s175_s28, 512, %s297_s3, [#allocation3], %s229_s10, %s229_s10, %s230_s11  }
  0xbd   :  { %222 = dma.done.wait [#allocation3], 512  }
  0xbe   :  { %223 = vsyncadd [#allocation3], 4294966784 }
  0xbf   :  { %184 = vsyncpa [#allocation3], 1 }

</bundles_post_ra>
